<compile_context>
chip_gen: v7x
topology: tpu7x:2x2x1
jax: 0.10.0
libtpu: 0.0.40
codegen_flags: <defaults>
</compile_context>

<pallas_src>
import numpy as np
import jax
import jax.numpy as jnp
from jax.experimental import pallas as pl
from jax.experimental.pallas import tpu as pltpu


# ----------------------------------------------------------------------------
# Fused kernel: style linear + modulated 1x1 conv (+ prev_rgb) (+ upsample+blur)
# ----------------------------------------------------------------------------
def _make_rgb_kernel(has_prev: bool, upsample: bool, B: int, C: int, O: int):
    def kernel(*refs):
        refs = list(refs)
        istyle_ref = refs.pop(0)                       # (B, L)        f32
        x_ref = refs.pop(0)                            # (B*C, HW)     f32
        prev_ref = refs.pop(0) if has_prev else None   # (B*O, HW)     f32
        wst_ref = refs.pop(0)                          # (C, L)        f32
        bst_ref = refs.pop(0)                          # (1, C)        f32
        wconv_ref = refs.pop(0)                        # (O, C)        f32
        tk_ref = refs.pop(0) if upsample else None     # (HW, 4*HW)    bf16
        out_ref = refs.pop(0)                          # (B*O, HW or 4*HW) f32

        # style = istyle @ Wst^T + bst  — exact f32 on VPU/XLU (tiny: B x C).
        ist = istyle_ref[...]                                              # (B, L)
        style = jnp.sum(wst_ref[...][None, :, :] * ist[:, None, :], axis=2)  # (B, C)
        style = style + bst_ref[...]                                       # (B, C)

        # demod=False -> modulate the 24 weights, not the (C, HW) activations.
        w_eff = wconv_ref[...][None, :, :] * (style[:, None, :] + 1.0)     # (B, O, C)

        # 1x1 modulated conv: B*O rows of C broadcast multiply-adds on the VPU,
        # stacked into one lane-dense (B*O, HW) slab for a single MXU dot.
        x2 = x_ref[...]                                                    # (B*C, HW)
        rows = []
        for b in range(B):
            xb = x2[b * C:(b + 1) * C, :]                                  # (C, HW)
            for o in range(O):
                r = w_eff[b, o:o + 1, 0:1] * xb[0:1, :]                    # (1, HW)
                for c in range(1, C):
                    r = r + w_eff[b, o:o + 1, c:c + 1] * xb[c:c + 1, :]
                rows.append(r)
        y = jnp.concatenate(rows, axis=0)                                  # (B*O, HW)

        if has_prev:
            y = y + prev_ref[...]                                          # (B*O, HW)

        if upsample:
            # Bilinear 2x (align_corners=False) + reflect-padded [1,2,1]/16 blur
            # as one MXU matmul on the flattened spatial axis.  tk is bf16
            # (entries are exact dyadic fractions); cast y to bf16 to match the
            # DEFAULT MXU precision explicitly, accumulate in f32.
            y = jnp.dot(y.astype(jnp.bfloat16), tk_ref[...],
                        preferred_element_type=jnp.float32)                # (B*O, 4*HW)

        out_ref[...] = y

    return kernel


# ----------------------------------------------------------------------------
# Host-side constant operators (parameter-style glue)
# ----------------------------------------------------------------------------
def _up_blur_matrix_np(n):
    """(2n, n) operator = [reflect-padded [1,2,1]/4 blur] @ [bilinear 2x upsample]."""
    # bilinear 2x, align_corners=False:
    #   out[2k]   = 0.25*in[max(k-1,0)] + 0.75*in[k]
    #   out[2k+1] = 0.75*in[k]          + 0.25*in[min(k+1, n-1)]
    U = np.zeros((2 * n, n), dtype=np.float64)
    for k in range(n):
        U[2 * k, max(k - 1, 0)] += 0.25
        U[2 * k, k] += 0.75
        U[2 * k + 1, k] += 0.75
        U[2 * k + 1, min(k + 1, n - 1)] += 0.25
    m = 2 * n

    def refl(i):  # torch 'reflect' padding (edge not repeated)
        if i < 0:
            return -i
        if i >= m:
            return 2 * (m - 1) - i
        return i

    Bm = np.zeros((m, m), dtype=np.float64)
    for i in range(m):
        Bm[i, refl(i - 1)] += 0.25
        Bm[i, i] += 0.5
        Bm[i, refl(i + 1)] += 0.25
    return Bm @ U                                   # (2n, n) float64


def _up_blur_kron(h, w):
    """(h*w, 2h*2w) bf16 operator = kron(T_H, T_W)^T so that Z_flat = Y_flat @ result.

    All entries are k/256 dyadic fractions -> exactly representable in bf16.
    """
    th = _up_blur_matrix_np(h)                      # (2h, h)
    tw = _up_blur_matrix_np(w)                      # (2w, w)
    t = np.kron(th, tw)                             # (2h*2w, h*w) float64
    return jnp.asarray(t.T, dtype=jnp.bfloat16)     # (h*w, 2h*2w) bf16, exact


# ----------------------------------------------------------------------------
# Wrapper
# ----------------------------------------------------------------------------
def rgb_block_forward(x, prev_rgb, istyle, params, upsample=True):
    x = x.astype(jnp.float32)
    B, C, H, W = x.shape
    wst = params["to_style_w"].astype(jnp.float32)          # (C, L)
    bst = params["to_style_b"].astype(jnp.float32)          # (C,)
    wconv = params["conv_w"].astype(jnp.float32)            # (O, C, 1, 1)
    O = wconv.shape[0]
    L = wst.shape[1]
    HW = H * W

    has_prev = prev_rgb is not None

    x2 = x.reshape(B * C, HW)
    istyle2 = istyle.astype(jnp.float32).reshape(B, L)
    wconv2 = wconv.reshape(O, C)
    bst2 = bst.reshape(1, C)

    inputs = [istyle2, x2]
    if has_prev:
        inputs.append(prev_rgb.astype(jnp.float32).reshape(B * O, HW))
    inputs += [wst, bst2, wconv2]

    if upsample:
        if HW > 1024:
            # TODO(synk): implement the separable T_H @ Y @ T_W^T (or pltpu.roll
            # 3-tap stencil) path; the dense Kronecker operator is O((H*W)^2)
            # and would blow past VMEM for larger spectrogram blocks.
            raise NotImplementedError(
                "dense Kronecker upsample operator only supported for H*W <= 1024")
        inputs.append(_up_blur_kron(H, W))                   # (HW, 4*HW) bf16
        out_cols = 4 * HW
    else:
        out_cols = HW

    kernel = _make_rgb_kernel(has_prev=has_prev, upsample=upsample, B=B, C=C, O=O)

    # Single kernel invocation (no grid): all operands live whole in VMEM
    # (~0.6 MiB total), batch is folded into one lane-dense slab, and there is
    # no multi-buffering / per-grid-step overhead.  On v7x a grid=(B,)
    # "parallel" megacore split would duplicate the dominant `tk` DMA per core,
    # so the folded single-core form is used on all generations.
    out = pl.pallas_call(
        kernel,
        out_shape=jax.ShapeDtypeStruct((B * O, out_cols), jnp.float32),
        in_specs=[pl.BlockSpec(memory_space=pltpu.MemorySpace.VMEM)] * len(inputs),
        out_specs=pl.BlockSpec(memory_space=pltpu.MemorySpace.VMEM),
    )(*inputs)

    if upsample:
        return out.reshape(B, O, 2 * H, 2 * W)
    return out.reshape(B, O, H, W)


# ----------------------------------------------------------------------------
# Pure numpy (float64) reference of the PyTorch forward, for verification.
# ----------------------------------------------------------------------------
def _ref_forward(x, prev, istyle, wst, bst, wconv, upsample=True):
    x = np.asarray(x, np.float64)
    istyle = np.asarray(istyle, np.float64)
    wst = np.asarray(wst, np.float64)
    bst = np.asarray(bst, np.float64)
    wconv = np.asarray(wconv, np.float64).reshape(wconv.shape[0], wconv.shape[1])

    style = istyle @ wst.T + bst                                   # (B, C)
    w = wconv[None, :, :] * (style[:, None, :] + 1.0)              # (B, O, C)
    y = np.einsum("boc,bchw->bohw", w, x)
    if prev is not None:
        y = y + np.asarray(prev, np.float64)
    if not upsample:
        return y

    def up_axis(a, axis):
        n = a.shape[axis]
        idx = np.arange(2 * n)
        src = np.maximum(0.5 * idx - 0.25, 0.0)
        i0 = np.floor(src).astype(int)
        i1 = np.minimum(i0 + 1, n - 1)
        l1 = src - i0
        a0 = np.take(a, i0, axis=axis)
        a1 = np.take(a, i1, axis=axis)
        shape = [1] * a.ndim
        shape[axis] = 2 * n
        l1 = l1.reshape(shape)
        return (1.0 - l1) * a0 + l1 * a1

    y = up_axis(y, 2)
    y = up_axis(y, 3)
    yp = np.pad(y, ((0, 0), (0, 0), (1, 1), (1, 1)), mode="reflect")
    k = np.array([1.0, 2.0, 1.0])
    k2 = np.outer(k, k) / 16.0
    H2, W2 = y.shape[2], y.shape[3]
    out = np.zeros_like(y)
    for i in range(3):
        for j in range(3):
            out += k2[i, j] * yp[:, :, i:i + H2, j:j + W2]
    return out


if __name__ == "__main__":
    B, L, C, O, H, W = 2, 32, 4, 3, 16, 16   # latent_dim=32, input_channel=4, channels=3

    key = jax.random.PRNGKey(0)
    ks = jax.random.split(key, 6)
    x = jax.random.normal(ks[0], (B, C, H, W), jnp.float32)
    prev_rgb = jax.random.normal(ks[1], (B, O, H, W), jnp.float32)
    istyle = jax.random.normal(ks[2], (B, L), jnp.float32)

    # Deterministic parameter init (shapes match the torch module's __init__).
    bound = 1.0 / np.sqrt(L)
    to_style_w = jax.random.uniform(ks[3], (C, L), jnp.float32, -bound, bound)
    to_style_b = jax.random.uniform(ks[4], (C,), jnp.float32, -bound, bound)
    # kaiming_normal_(fan_in, leaky_relu a=0) -> std = sqrt(2/fan_in), fan_in = C*1*1
    conv_w = jax.random.normal(ks[5], (O, C, 1, 1), jnp.float32) * np.sqrt(2.0 / C)

    params = {"to_style_w": to_style_w, "to_style_b": to_style_b, "conv_w": conv_w}

    # 1) main path: prev_rgb present, upsample=True (bf16 MXU operands
    #    -> bf16-rounded activations in the blur matmul; tolerance set accordingly)
    out = jax.block_until_ready(
        rgb_block_forward(x, prev_rgb, istyle, params, upsample=True))
    assert out.shape == (B, O, 2 * H, 2 * W)
    ref = _ref_forward(x, prev_rgb, istyle, to_style_w, to_style_b, conv_w,
                       upsample=True)
    np.testing.assert_allclose(np.asarray(out), ref, rtol=5e-3, atol=2e-2)

    # 2) prev_rgb=None variant (kernel built without the prev input / DMA)
    out2 = jax.block_until_ready(
        rgb_block_forward(x, None, istyle, params, upsample=True))
    ref2 = _ref_forward(x, None, istyle, to_style_w, to_style_b, conv_w,
                        upsample=True)
    np.testing.assert_allclose(np.asarray(out2), ref2, rtol=5e-3, atol=2e-2)

    # 3) upsample=False variant (pure-VPU exact f32 path -> tight tolerance)
    out3 = jax.block_until_ready(
        rgb_block_forward(x, prev_rgb, istyle, params, upsample=False))
    assert out3.shape == (B, O, H, W)
    ref3 = _ref_forward(x, prev_rgb, istyle, to_style_w, to_style_b, conv_w,
                        upsample=False)
    np.testing.assert_allclose(np.asarray(out3), ref3, rtol=1e-5, atol=1e-5)

    print("KERNEL_OK")
</pallas_src>

<mosaic_0001>
module attributes {stable_mosaic.version = 11 : i64} {
  func.func @kernel(%arg0: memref<2x32xf32, #tpu.memory_space<vmem>>, %arg1: memref<8x256xf32, #tpu.memory_space<vmem>>, %arg2: memref<6x256xf32, #tpu.memory_space<vmem>>, %arg3: memref<4x32xf32, #tpu.memory_space<vmem>>, %arg4: memref<1x4xf32, #tpu.memory_space<vmem>>, %arg5: memref<3x4xf32, #tpu.memory_space<vmem>>, %arg6: memref<256x1024xbf16, #tpu.memory_space<vmem>>, %arg7: memref<6x1024xf32, #tpu.memory_space<vmem>>) attributes {dimension_semantics = [], scalar_prefetch = 0 : i64, scratch_operands = 0 : i64, tpu.core_type = #tpu.core_type<tc>} {
    %c0 = arith.constant 0 : index
    %c0_0 = arith.constant 0 : index
    %0 = vector.load %arg0[%c0, %c0_0] : memref<2x32xf32, #tpu.memory_space<vmem>>, vector<2x32xf32>
    %c0_1 = arith.constant 0 : index
    %c0_2 = arith.constant 0 : index
    %1 = vector.load %arg3[%c0_1, %c0_2] : memref<4x32xf32, #tpu.memory_space<vmem>>, vector<4x32xf32>
    %2 = vector.shape_cast %1 : vector<4x32xf32> to vector<1x4x32xf32>
    %3 = vector.shape_cast %0 : vector<2x32xf32> to vector<2x1x32xf32>
    %4 = vector.broadcast %2 : vector<1x4x32xf32> to vector<2x4x32xf32>
    %5 = vector.broadcast %3 : vector<2x1x32xf32> to vector<2x4x32xf32>
    %6 = arith.mulf %4, %5 : vector<2x4x32xf32>
    %cst = arith.constant dense<0.000000e+00> : vector<2x4xf32>
    %7 = vector.multi_reduction <add>, %6, %cst [2] : vector<2x4x32xf32> to vector<2x4xf32>
    %c0_3 = arith.constant 0 : index
    %c0_4 = arith.constant 0 : index
    %8 = vector.load %arg4[%c0_3, %c0_4] : memref<1x4xf32, #tpu.memory_space<vmem>>, vector<1x4xf32>
    %9 = vector.broadcast %8 : vector<1x4xf32> to vector<2x4xf32>
    %10 = arith.addf %7, %9 : vector<2x4xf32>
    %c0_5 = arith.constant 0 : index
    %c0_6 = arith.constant 0 : index
    %11 = vector.load %arg5[%c0_5, %c0_6] : memref<3x4xf32, #tpu.memory_space<vmem>>, vector<3x4xf32>
    %12 = vector.shape_cast %11 : vector<3x4xf32> to vector<1x3x4xf32>
    %13 = vector.shape_cast %10 : vector<2x4xf32> to vector<2x1x4xf32>
    %cst_7 = arith.constant 1.000000e+00 : f32
    %14 = vector.broadcast %cst_7 : f32 to vector<2x1x4xf32>
    %15 = arith.addf %13, %14 : vector<2x1x4xf32>
    %16 = vector.broadcast %12 : vector<1x3x4xf32> to vector<2x3x4xf32>
    %17 = vector.broadcast %15 : vector<2x1x4xf32> to vector<2x3x4xf32>
    %18 = arith.mulf %16, %17 : vector<2x3x4xf32>
    %c0_8 = arith.constant 0 : index
    %c0_9 = arith.constant 0 : index
    %19 = vector.load %arg1[%c0_8, %c0_9] : memref<8x256xf32, #tpu.memory_space<vmem>>, vector<8x256xf32>
    %20 = vector.extract_strided_slice %19 {offsets = [0, 0], sizes = [4, 256], strides = [1, 1]} : vector<8x256xf32> to vector<4x256xf32>
    %21 = vector.extract_strided_slice %18 {offsets = [0, 0, 0], sizes = [1, 1, 1], strides = [1, 1, 1]} : vector<2x3x4xf32> to vector<1x1x1xf32>
    %22 = vector.shape_cast %21 : vector<1x1x1xf32> to vector<1x1xf32>
    %23 = vector.extract_strided_slice %20 {offsets = [0, 0], sizes = [1, 256], strides = [1, 1]} : vector<4x256xf32> to vector<1x256xf32>
    %24 = vector.broadcast %22 : vector<1x1xf32> to vector<1x256xf32>
    %25 = arith.mulf %24, %23 : vector<1x256xf32>
    %26 = vector.extract_strided_slice %18 {offsets = [0, 0, 1], sizes = [1, 1, 1], strides = [1, 1, 1]} : vector<2x3x4xf32> to vector<1x1x1xf32>
    %27 = vector.shape_cast %26 : vector<1x1x1xf32> to vector<1x1xf32>
    %28 = vector.extract_strided_slice %20 {offsets = [1, 0], sizes = [1, 256], strides = [1, 1]} : vector<4x256xf32> to vector<1x256xf32>
    %29 = vector.broadcast %27 : vector<1x1xf32> to vector<1x256xf32>
    %30 = arith.mulf %29, %28 : vector<1x256xf32>
    %31 = arith.addf %25, %30 : vector<1x256xf32>
    %32 = vector.extract_strided_slice %18 {offsets = [0, 0, 2], sizes = [1, 1, 1], strides = [1, 1, 1]} : vector<2x3x4xf32> to vector<1x1x1xf32>
    %33 = vector.shape_cast %32 : vector<1x1x1xf32> to vector<1x1xf32>
    %34 = vector.extract_strided_slice %20 {offsets = [2, 0], sizes = [1, 256], strides = [1, 1]} : vector<4x256xf32> to vector<1x256xf32>
    %35 = vector.broadcast %33 : vector<1x1xf32> to vector<1x256xf32>
    %36 = arith.mulf %35, %34 : vector<1x256xf32>
    %37 = arith.addf %31, %36 : vector<1x256xf32>
    %38 = vector.extract_strided_slice %18 {offsets = [0, 0, 3], sizes = [1, 1, 1], strides = [1, 1, 1]} : vector<2x3x4xf32> to vector<1x1x1xf32>
    %39 = vector.shape_cast %38 : vector<1x1x1xf32> to vector<1x1xf32>
    %40 = vector.extract_strided_slice %20 {offsets = [3, 0], sizes = [1, 256], strides = [1, 1]} : vector<4x256xf32> to vector<1x256xf32>
    %41 = vector.broadcast %39 : vector<1x1xf32> to vector<1x256xf32>
    %42 = arith.mulf %41, %40 : vector<1x256xf32>
    %43 = arith.addf %37, %42 : vector<1x256xf32>
    %44 = vector.extract_strided_slice %18 {offsets = [0, 1, 0], sizes = [1, 1, 1], strides = [1, 1, 1]} : vector<2x3x4xf32> to vector<1x1x1xf32>
    %45 = vector.shape_cast %44 : vector<1x1x1xf32> to vector<1x1xf32>
    %46 = vector.extract_strided_slice %20 {offsets = [0, 0], sizes = [1, 256], strides = [1, 1]} : vector<4x256xf32> to vector<1x256xf32>
    %47 = vector.broadcast %45 : vector<1x1xf32> to vector<1x256xf32>
    %48 = arith.mulf %47, %46 : vector<1x256xf32>
    %49 = vector.extract_strided_slice %18 {offsets = [0, 1, 1], sizes = [1, 1, 1], strides = [1, 1, 1]} : vector<2x3x4xf32> to vector<1x1x1xf32>
    %50 = vector.shape_cast %49 : vector<1x1x1xf32> to vector<1x1xf32>
    %51 = vector.extract_strided_slice %20 {offsets = [1, 0], sizes = [1, 256], strides = [1, 1]} : vector<4x256xf32> to vector<1x256xf32>
    %52 = vector.broadcast %50 : vector<1x1xf32> to vector<1x256xf32>
    %53 = arith.mulf %52, %51 : vector<1x256xf32>
    %54 = arith.addf %48, %53 : vector<1x256xf32>
    %55 = vector.extract_strided_slice %18 {offsets = [0, 1, 2], sizes = [1, 1, 1], strides = [1, 1, 1]} : vector<2x3x4xf32> to vector<1x1x1xf32>
    %56 = vector.shape_cast %55 : vector<1x1x1xf32> to vector<1x1xf32>
    %57 = vector.extract_strided_slice %20 {offsets = [2, 0], sizes = [1, 256], strides = [1, 1]} : vector<4x256xf32> to vector<1x256xf32>
    %58 = vector.broadcast %56 : vector<1x1xf32> to vector<1x256xf32>
    %59 = arith.mulf %58, %57 : vector<1x256xf32>
    %60 = arith.addf %54, %59 : vector<1x256xf32>
    %61 = vector.extract_strided_slice %18 {offsets = [0, 1, 3], sizes = [1, 1, 1], strides = [1, 1, 1]} : vector<2x3x4xf32> to vector<1x1x1xf32>
    %62 = vector.shape_cast %61 : vector<1x1x1xf32> to vector<1x1xf32>
    %63 = vector.extract_strided_slice %20 {offsets = [3, 0], sizes = [1, 256], strides = [1, 1]} : vector<4x256xf32> to vector<1x256xf32>
    %64 = vector.broadcast %62 : vector<1x1xf32> to vector<1x256xf32>
    %65 = arith.mulf %64, %63 : vector<1x256xf32>
    %66 = arith.addf %60, %65 : vector<1x256xf32>
    %67 = vector.extract_strided_slice %18 {offsets = [0, 2, 0], sizes = [1, 1, 1], strides = [1, 1, 1]} : vector<2x3x4xf32> to vector<1x1x1xf32>
    %68 = vector.shape_cast %67 : vector<1x1x1xf32> to vector<1x1xf32>
    %69 = vector.extract_strided_slice %20 {offsets = [0, 0], sizes = [1, 256], strides = [1, 1]} : vector<4x256xf32> to vector<1x256xf32>
    %70 = vector.broadcast %68 : vector<1x1xf32> to vector<1x256xf32>
    %71 = arith.mulf %70, %69 : vector<1x256xf32>
    %72 = vector.extract_strided_slice %18 {offsets = [0, 2, 1], sizes = [1, 1, 1], strides = [1, 1, 1]} : vector<2x3x4xf32> to vector<1x1x1xf32>
    %73 = vector.shape_cast %72 : vector<1x1x1xf32> to vector<1x1xf32>
    %74 = vector.extract_strided_slice %20 {offsets = [1, 0], sizes = [1, 256], strides = [1, 1]} : vector<4x256xf32> to vector<1x256xf32>
    %75 = vector.broadcast %73 : vector<1x1xf32> to vector<1x256xf32>
    %76 = arith.mulf %75, %74 : vector<1x256xf32>
    %77 = arith.addf %71, %76 : vector<1x256xf32>
    %78 = vector.extract_strided_slice %18 {offsets = [0, 2, 2], sizes = [1, 1, 1], strides = [1, 1, 1]} : vector<2x3x4xf32> to vector<1x1x1xf32>
    %79 = vector.shape_cast %78 : vector<1x1x1xf32> to vector<1x1xf32>
    %80 = vector.extract_strided_slice %20 {offsets = [2, 0], sizes = [1, 256], strides = [1, 1]} : vector<4x256xf32> to vector<1x256xf32>
    %81 = vector.broadcast %79 : vector<1x1xf32> to vector<1x256xf32>
    %82 = arith.mulf %81, %80 : vector<1x256xf32>
    %83 = arith.addf %77, %82 : vector<1x256xf32>
    %84 = vector.extract_strided_slice %18 {offsets = [0, 2, 3], sizes = [1, 1, 1], strides = [1, 1, 1]} : vector<2x3x4xf32> to vector<1x1x1xf32>
    %85 = vector.shape_cast %84 : vector<1x1x1xf32> to vector<1x1xf32>
    %86 = vector.extract_strided_slice %20 {offsets = [3, 0], sizes = [1, 256], strides = [1, 1]} : vector<4x256xf32> to vector<1x256xf32>
    %87 = vector.broadcast %85 : vector<1x1xf32> to vector<1x256xf32>
    %88 = arith.mulf %87, %86 : vector<1x256xf32>
    %89 = arith.addf %83, %88 : vector<1x256xf32>
    %90 = vector.extract_strided_slice %19 {offsets = [4, 0], sizes = [4, 256], strides = [1, 1]} : vector<8x256xf32> to vector<4x256xf32>
    %91 = vector.extract_strided_slice %18 {offsets = [1, 0, 0], sizes = [1, 1, 1], strides = [1, 1, 1]} : vector<2x3x4xf32> to vector<1x1x1xf32>
    %92 = vector.shape_cast %91 : vector<1x1x1xf32> to vector<1x1xf32>
    %93 = vector.extract_strided_slice %90 {offsets = [0, 0], sizes = [1, 256], strides = [1, 1]} : vector<4x256xf32> to vector<1x256xf32>
    %94 = vector.broadcast %92 : vector<1x1xf32> to vector<1x256xf32>
    %95 = arith.mulf %94, %93 : vector<1x256xf32>
    %96 = vector.extract_strided_slice %18 {offsets = [1, 0, 1], sizes = [1, 1, 1], strides = [1, 1, 1]} : vector<2x3x4xf32> to vector<1x1x1xf32>
    %97 = vector.shape_cast %96 : vector<1x1x1xf32> to vector<1x1xf32>
    %98 = vector.extract_strided_slice %90 {offsets = [1, 0], sizes = [1, 256], strides = [1, 1]} : vector<4x256xf32> to vector<1x256xf32>
    %99 = vector.broadcast %97 : vector<1x1xf32> to vector<1x256xf32>
    %100 = arith.mulf %99, %98 : vector<1x256xf32>
    %101 = arith.addf %95, %100 : vector<1x256xf32>
    %102 = vector.extract_strided_slice %18 {offsets = [1, 0, 2], sizes = [1, 1, 1], strides = [1, 1, 1]} : vector<2x3x4xf32> to vector<1x1x1xf32>
    %103 = vector.shape_cast %102 : vector<1x1x1xf32> to vector<1x1xf32>
    %104 = vector.extract_strided_slice %90 {offsets = [2, 0], sizes = [1, 256], strides = [1, 1]} : vector<4x256xf32> to vector<1x256xf32>
    %105 = vector.broadcast %103 : vector<1x1xf32> to vector<1x256xf32>
    %106 = arith.mulf %105, %104 : vector<1x256xf32>
    %107 = arith.addf %101, %106 : vector<1x256xf32>
    %108 = vector.extract_strided_slice %18 {offsets = [1, 0, 3], sizes = [1, 1, 1], strides = [1, 1, 1]} : vector<2x3x4xf32> to vector<1x1x1xf32>
    %109 = vector.shape_cast %108 : vector<1x1x1xf32> to vector<1x1xf32>
    %110 = vector.extract_strided_slice %90 {offsets = [3, 0], sizes = [1, 256], strides = [1, 1]} : vector<4x256xf32> to vector<1x256xf32>
    %111 = vector.broadcast %109 : vector<1x1xf32> to vector<1x256xf32>
    %112 = arith.mulf %111, %110 : vector<1x256xf32>
    %113 = arith.addf %107, %112 : vector<1x256xf32>
    %114 = vector.extract_strided_slice %18 {offsets = [1, 1, 0], sizes = [1, 1, 1], strides = [1, 1, 1]} : vector<2x3x4xf32> to vector<1x1x1xf32>
    %115 = vector.shape_cast %114 : vector<1x1x1xf32> to vector<1x1xf32>
    %116 = vector.extract_strided_slice %90 {offsets = [0, 0], sizes = [1, 256], strides = [1, 1]} : vector<4x256xf32> to vector<1x256xf32>
    %117 = vector.broadcast %115 : vector<1x1xf32> to vector<1x256xf32>
    %118 = arith.mulf %117, %116 : vector<1x256xf32>
    %119 = vector.extract_strided_slice %18 {offsets = [1, 1, 1], sizes = [1, 1, 1], strides = [1, 1, 1]} : vector<2x3x4xf32> to vector<1x1x1xf32>
    %120 = vector.shape_cast %119 : vector<1x1x1xf32> to vector<1x1xf32>
    %121 = vector.extract_strided_slice %90 {offsets = [1, 0], sizes = [1, 256], strides = [1, 1]} : vector<4x256xf32> to vector<1x256xf32>
    %122 = vector.broadcast %120 : vector<1x1xf32> to vector<1x256xf32>
    %123 = arith.mulf %122, %121 : vector<1x256xf32>
    %124 = arith.addf %118, %123 : vector<1x256xf32>
    %125 = vector.extract_strided_slice %18 {offsets = [1, 1, 2], sizes = [1, 1, 1], strides = [1, 1, 1]} : vector<2x3x4xf32> to vector<1x1x1xf32>
    %126 = vector.shape_cast %125 : vector<1x1x1xf32> to vector<1x1xf32>
    %127 = vector.extract_strided_slice %90 {offsets = [2, 0], sizes = [1, 256], strides = [1, 1]} : vector<4x256xf32> to vector<1x256xf32>
    %128 = vector.broadcast %126 : vector<1x1xf32> to vector<1x256xf32>
    %129 = arith.mulf %128, %127 : vector<1x256xf32>
    %130 = arith.addf %124, %129 : vector<1x256xf32>
    %131 = vector.extract_strided_slice %18 {offsets = [1, 1, 3], sizes = [1, 1, 1], strides = [1, 1, 1]} : vector<2x3x4xf32> to vector<1x1x1xf32>
    %132 = vector.shape_cast %131 : vector<1x1x1xf32> to vector<1x1xf32>
    %133 = vector.extract_strided_slice %90 {offsets = [3, 0], sizes = [1, 256], strides = [1, 1]} : vector<4x256xf32> to vector<1x256xf32>
    %134 = vector.broadcast %132 : vector<1x1xf32> to vector<1x256xf32>
    %135 = arith.mulf %134, %133 : vector<1x256xf32>
    %136 = arith.addf %130, %135 : vector<1x256xf32>
    %137 = vector.extract_strided_slice %18 {offsets = [1, 2, 0], sizes = [1, 1, 1], strides = [1, 1, 1]} : vector<2x3x4xf32> to vector<1x1x1xf32>
    %138 = vector.shape_cast %137 : vector<1x1x1xf32> to vector<1x1xf32>
    %139 = vector.extract_strided_slice %90 {offsets = [0, 0], sizes = [1, 256], strides = [1, 1]} : vector<4x256xf32> to vector<1x256xf32>
    %140 = vector.broadcast %138 : vector<1x1xf32> to vector<1x256xf32>
    %141 = arith.mulf %140, %139 : vector<1x256xf32>
    %142 = vector.extract_strided_slice %18 {offsets = [1, 2, 1], sizes = [1, 1, 1], strides = [1, 1, 1]} : vector<2x3x4xf32> to vector<1x1x1xf32>
    %143 = vector.shape_cast %142 : vector<1x1x1xf32> to vector<1x1xf32>
    %144 = vector.extract_strided_slice %90 {offsets = [1, 0], sizes = [1, 256], strides = [1, 1]} : vector<4x256xf32> to vector<1x256xf32>
    %145 = vector.broadcast %143 : vector<1x1xf32> to vector<1x256xf32>
    %146 = arith.mulf %145, %144 : vector<1x256xf32>
    %147 = arith.addf %141, %146 : vector<1x256xf32>
    %148 = vector.extract_strided_slice %18 {offsets = [1, 2, 2], sizes = [1, 1, 1], strides = [1, 1, 1]} : vector<2x3x4xf32> to vector<1x1x1xf32>
    %149 = vector.shape_cast %148 : vector<1x1x1xf32> to vector<1x1xf32>
    %150 = vector.extract_strided_slice %90 {offsets = [2, 0], sizes = [1, 256], strides = [1, 1]} : vector<4x256xf32> to vector<1x256xf32>
    %151 = vector.broadcast %149 : vector<1x1xf32> to vector<1x256xf32>
    %152 = arith.mulf %151, %150 : vector<1x256xf32>
    %153 = arith.addf %147, %152 : vector<1x256xf32>
    %154 = vector.extract_strided_slice %18 {offsets = [1, 2, 3], sizes = [1, 1, 1], strides = [1, 1, 1]} : vector<2x3x4xf32> to vector<1x1x1xf32>
    %155 = vector.shape_cast %154 : vector<1x1x1xf32> to vector<1x1xf32>
    %156 = vector.extract_strided_slice %90 {offsets = [3, 0], sizes = [1, 256], strides = [1, 1]} : vector<4x256xf32> to vector<1x256xf32>
    %157 = vector.broadcast %155 : vector<1x1xf32> to vector<1x256xf32>
    %158 = arith.mulf %157, %156 : vector<1x256xf32>
    %159 = arith.addf %153, %158 : vector<1x256xf32>
    %160 = tpu.concatenate %43, %66, %89, %113, %136, %159 in 0 : vector<1x256xf32>, vector<1x256xf32>, vector<1x256xf32>, vector<1x256xf32>, vector<1x256xf32>, vector<1x256xf32> -> vector<6x256xf32>
    %c0_10 = arith.constant 0 : index
    %c0_11 = arith.constant 0 : index
    %161 = vector.load %arg2[%c0_10, %c0_11] : memref<6x256xf32, #tpu.memory_space<vmem>>, vector<6x256xf32>
    %162 = arith.addf %160, %161 : vector<6x256xf32>
    %163 = arith.truncf %162 : vector<6x256xf32> to vector<6x256xbf16>
    %c0_12 = arith.constant 0 : index
    %c0_13 = arith.constant 0 : index
    %164 = vector.load %arg6[%c0_12, %c0_13] : memref<256x1024xbf16, #tpu.memory_space<vmem>>, vector<256x1024xbf16>
    %cst_14 = arith.constant dense<0.000000e+00> : vector<6x1024xf32>
    %165 = tpu.matmul %163, %164, %cst_14 {dimension_numbers = #tpu.dot_dimension_numbers<[1], [0], [0], [1], [0, 0, 1, 1], [], []>} : vector<6x256xbf16>, vector<256x1024xbf16>, vector<6x1024xf32> -> vector<6x1024xf32>
    %c0_15 = arith.constant 0 : index
    %c0_16 = arith.constant 0 : index
    %166 = vector.load %arg7[%c0_15, %c0_16] : memref<6x1024xf32, #tpu.memory_space<vmem>>, vector<6x1024xf32>
    tpu.vector_store %arg7[%c0_15, %c0_16], %165 {strides = array<i32>} : memref<6x1024xf32, #tpu.memory_space<vmem>>, vector<6x1024xf32>,
    return
  }
}

</mosaic_0001>

<bundles_post_ra>
// kernel: tpu_custom_call.1
= control target key start
LH: loop header
LB: loop body
LE: loop exit
PB: predicated region body
PF: predicated region fallthrough
CT: control target
= control target key end

     0   :  { %12 = vsyncpa [#allocation3], 0  ;;  %s1804_s0 = inlined_call_operand.hbm [shape: f32[2,32], index: 0, kind: input, shape index: {}]   ;;  %s1805_s1 = inlined_call_operand.hbm [shape: f32[8,256], index: 1, kind: input, shape index: {}]   ;;  %s1806_s2 = inlined_call_operand.hbm [shape: f32[6,256], index: 2, kind: input, shape index: {}]   ;;  %s1807_s3 = inlined_call_operand.vmem [shape: f32[4,32], index: 3, kind: input, shape index: {}]   ;;  %s1808_s4 = inlined_call_operand.vmem [shape: f32[1,4], index: 4, kind: input, shape index: {}]   ;;  %s1809_s5 = inlined_call_operand.vmem [shape: f32[3,4], index: 5, kind: input, shape index: {}]   ;;  %s1810_s6 = inlined_call_operand.hbm [shape: bf16[256,1024], index: 6, kind: input, shape index: {}]   ;;  %s1811_s7 = inlined_call_operand.hbm [shape: f32[6,1024], index: 7, kind: output, shape index: {}]  }
   0x1   :  { %13 = vsyncpa [#allocation6], 0 }
   0x2   :  { %14 = vsyncpa [#allocation9], 0 }
   0x3   :  { %15 = vsyncpa [#allocation4], 0  ;;  %s1576_s24 = smov [#allocation5]   ;;  %s1577_s26 = smov [#allocation2]  }
   0x4   :  { %s32_s25 = sshll.u32 %s1576_s24, 4  ;;  %s22_s27 = sshll.u32 %s1577_s26, 4  ;;  %s33_s25 = int_to_ptr.vmem [resolvable:$true] %s32_s25  ;;  %s23_s27 = int_to_ptr.vmem [resolvable:$true] %s22_s27 }
   0x5   :  { %s1458_s30 = scalar_lea.hbm %s1805_s1, 256 }
   0x6   :  { %p1459_p0 = scmp.ne.s32.totalorder %s1805_s1, %s1458_s30  ;;  %p1462_p1 = scmp.lt.u32.totalorder %s1458_s30, %s1805_s1 }
   0x8   :  { %p1464_p2 = pnand %p1462_p1, %p1459_p0 }
   0xa   :  { %1467 = shalt.err (!%p1464_p2)
}
   0xb   :  { %s1468_s12 = scalar_lea.vmem %s33_s25, 256  ;;  %p1473_p4 = scmp.lt.s32.totalorder %s33_s25, %s33_s25 }
   0xc   :  { %p1469_p3 = scmp.ne.s32.totalorder %s33_s25, %s1468_s12  ;;  %p1474_p5 = scmp.lt.s32.totalorder %s1468_s12, %s1468_s12 }
   0xe   :  { %p1475_p6 = por %p1474_p5, %p1473_p4 }
  0x10   :  { %p1476_p7 = pnand %p1475_p6, %p1469_p3 }
  0x12   :  { %1479 = shalt.err (!%p1476_p7)
}
  0x13   :  { %35 = dma.hbm_to_vmem [thread:$0]  %s1805_s1, 256, %s33_s25, [#allocation6]  }
  0x14   :  { %s1480_s17 = scalar_lea.hbm %s1804_s0, 32 }
  0x15   :  { %p1481_p8 = scmp.ne.s32.totalorder %s1804_s0, %s1480_s17  ;;  %p1484_p9 = scmp.lt.u32.totalorder %s1480_s17, %s1804_s0 }
  0x17   :  { %p1486_p10 = pnand %p1484_p9, %p1481_p8 }
  0x19   :  { %1489 = shalt.err (!%p1486_p10)
}
  0x1a   :  { %s1490_s22 = scalar_lea.vmem %s23_s27, 32  ;;  %p1495_p12 = scmp.lt.s32.totalorder %s23_s27, %s23_s27 }
  0x1b   :  { %p1491_p11 = scmp.ne.s32.totalorder %s23_s27, %s1490_s22  ;;  %p1496_p13 = scmp.lt.s32.totalorder %s1490_s22, %s1490_s22 }
  0x1d   :  { %p1497_p0 = por %p1496_p13, %p1495_p12 }
  0x1f   :  { %p1498_p1 = pnand %p1497_p0, %p1491_p11 }
  0x21   :  { %1501 = shalt.err (!%p1498_p1)
}
  0x22   :  { %25 = dma.hbm_to_vmem [thread:$0]  %s1804_s0, 32, %s23_s27, [#allocation3]  }
  0x23   :  { %s1578_s24 = smov [#allocation7]   ;;  %s1579_s26 = smov [#allocation8]  }
  0x24   :  { %s42_s25 = sshll.u32 %s1578_s24, 4  ;;  %s57_s28 = sshll.u32 %s1579_s26, 4  ;;  %s43_s25 = int_to_ptr.vmem [resolvable:$true] %s42_s25  ;;  %s1652_s28 = int_to_ptr.vmem [resolvable:$true] %s57_s28 }
  0x25   :  { %s1502_s8 = scalar_lea.hbm %s1806_s2, 256 }
  0x26   :  { %p1503_p2 = scmp.ne.s32.totalorder %s1806_s2, %s1502_s8  ;;  %p1506_p3 = scmp.lt.u32.totalorder %s1502_s8, %s1806_s2 }
  0x28   :  { %p1508_p4 = pnand %p1506_p3, %p1503_p2 }
  0x2a   :  { %1511 = shalt.err (!%p1508_p4)
}
  0x2b   :  { %s1512_s0 = scalar_lea.vmem %s43_s25, 256  ;;  %p1517_p6 = scmp.lt.s32.totalorder %s43_s25, %s43_s25 }
  0x2c   :  { %p1513_p5 = scmp.ne.s32.totalorder %s43_s25, %s1512_s0  ;;  %p1518_p7 = scmp.lt.s32.totalorder %s1512_s0, %s1512_s0 }
  0x2e   :  { %p1519_p8 = por %p1518_p7, %p1517_p6 }
  0x30   :  { %p1520_p9 = pnand %p1519_p8, %p1513_p5 }
  0x32   :  { %1523 = shalt.err (!%p1520_p9)
}
  0x33   :  { %45 = dma.hbm_to_vmem [thread:$0]  %s1806_s2, 256, %s43_s25, [#allocation6]  }
  0x34   :  { %s1524_s16 = scalar_lea.hbm %s1810_s6, 16384 }
  0x35   :  { %p1525_p10 = scmp.ne.s32.totalorder %s1810_s6, %s1524_s16  ;;  %p1528_p11 = scmp.lt.u32.totalorder %s1524_s16, %s1810_s6 }
  0x37   :  { %p1530_p12 = pnand %p1528_p11, %p1525_p10 }
  0x39   :  { %1533 = shalt.err (!%p1530_p12)
}
  0x3a   :  { %s1534_s21 = scalar_lea.vmem %s1652_s28, 16384  ;;  %p1539_p0 = scmp.lt.s32.totalorder %s1652_s28, %s1652_s28 }
  0x3b   :  { %p1535_p13 = scmp.ne.s32.totalorder %s1652_s28, %s1534_s21  ;;  %p1540_p1 = scmp.lt.s32.totalorder %s1534_s21, %s1534_s21 }
  0x3d   :  { %p1541_p2 = por %p1540_p1, %p1539_p0 }
  0x3f   :  { %p1542_p3 = pnand %p1541_p2, %p1535_p13 }
  0x41   :  { %1545 = shalt.err (!%p1542_p3)
}
  0x42   :  { %s1580_s2 = smov 512   ;;  %s1581_s22 = smov 32  }
  0x43   :  { %63 = dma.hbm_to_vmem [thread:$0]  %s1810_s6, 16384, %s1652_s28, [#allocation9], %s1580_s2, %s1580_s2, %s1581_s22  }
  0x44   :  { %1568 = dma.done.wait [#allocation3], 32  }
  0x45   :  { %1569 = vsyncadd [#allocation3], 4294967264 }
  0x46   :  { %1570 = dma.done.wait [#allocation6], 512  }
  0x47   :  { %1571 = vsyncadd [#allocation6], 4294966784 }
  0x48   :  { %1572 = dma.done.wait [#allocation9], 16384  }
  0x49   :  { %1573 = vsyncadd [#allocation9], 4294950912  ;;  %v90_v0 = vlaneseq  ;;  %v1582_v1 = vmov 1966171168   ;;  %v1307_v10 = vld [vmem:[%s1808_s4] ss:$0 sm:$0xff] }
  0x4a   :  { %v88_v2 = vunpack.c.l.s4 %v1582_v1  ;;  %v1306_v7 = vld.sshfl [vmem:[#allocation2] sm:$0x11 pattern:$0x75316420]  ;;  %v77_v11 = vld [vmem:[%s1807_s3] sm:$0xf] }
  0x4b   :  { %v91_v3 = vshrl.u32 %v90_v0, 7  ;;  %v86_v9 = vcombine.high %v1306_v7, %v1306_v7  ;;  %127 = vbcast.lane.b32.xlu1 %v1307_v10, 256  ;;  %vm113_vm0 = vcmask 257024   ;;  %v1583_v19 = vmov 0   ;;  %v349_v30 = vld [vmem:[#allocation8] sm:$0xff]  ;;  %v350_v32 = vld [vmem:[#allocation8 + $0x8] sm:$0xff] }
  0x4c   :  { %v89_v4 = vunpack.c.0.s8 %v88_v2  ;;  %1448 = vset.pattern.permute.xlu1 %v1583_v19  ;;  %1449 = vset.pattern.permute.xlu0 %v1583_v19  ;;  %v144_v20 = vand.u32 127, %v90_v0  ;;  %v1584_v29 = vmov 3   ;;  %v353_v31 = vld [vmem:[#allocation8 + $0x20] sm:$0xff]  ;;  %v354_v34 = vld [vmem:[#allocation8 + $0x28] sm:$0xff]  ;;  %vm328_vm1 = vcmask 1040384  }
  0x4d   :  { %v103_v6 = vsub.s32 0, %v91_v3  ;;  %v1309_v33 = vcombine.high %v349_v30, %v353_v31  ;;  %v1308_v35 = vcombine.low %v349_v30, %v353_v31  ;;  %v357_v36 = vld [vmem:[#allocation8 + $0x40] sm:$0xff]  ;;  %v1311_v38 = vcombine.high %v350_v32, %v354_v34  ;;  %v358_v41 = vld [vmem:[#allocation8 + $0x48] sm:$0xff] }
  0x4e   :  { %v92_v5 = vsub.s32 %v89_v4, %v91_v3  ;;  %v1691_v21 = vsub.s32 %v144_v20, %v91_v3  ;;  %v361_v37 = vld [vmem:[#allocation8 + $0x60] sm:$0xff]  ;;  %v1310_v39 = vcombine.low %v350_v32, %v354_v34  ;;  %v362_v42 = vld [vmem:[#allocation8 + $0x68] sm:$0xff]  ;;  %v1586_v30 = vmov 2  }
  0x4f   :  { %v1317_v40 = vcombine.high %v357_v36, %v361_v37  ;;  %v365_v43 = vld [vmem:[#allocation8 + $0x80] sm:$0xff]  ;;  %1117 = vmatprep.subr.bf16.mxu0 %v1309_v33  ;;  %v1319_v44 = vcombine.high %v358_v41, %v362_v42  ;;  %v366_v46 = vld [vmem:[#allocation8 + $0x88] sm:$0xff]  ;;  %1158 = vmatprep.subr.bf16.mxu1 %v1311_v38  ;;  %v1316_v48 = vcombine.low %v357_v36, %v361_v37  ;;  %vm331_vm2 = vcmask 1041408  }
  0x50   :  { %v93_v8 = vrot.slane %v1306_v7, %v92_v5  ;;  %v100_v13 = vrot.slane %v86_v9, %v92_v5  ;;  %v369_v45 = vld [vmem:[#allocation8 + $0xa0] sm:$0xff]  ;;  %v370_v47 = vld [vmem:[#allocation8 + $0xa8] sm:$0xff]  ;;  %1118 = vmatpush1.bf16.msra.mxu0 %v1308_v35  ;;  %1159 = vmatpush1.bf16.msra.mxu1 %v1310_v39  ;;  %v1318_v49 = vcombine.low %v358_v41, %v362_v42  ;;  %vm334_vm3 = vcmask 1042432  }
  0x51   :  { %1119 = vmatprep.subr.bf16.mxu0 %v1317_v40  ;;  %v1325_v50 = vcombine.high %v365_v43, %v369_v45  ;;  %1160 = vmatprep.subr.bf16.mxu1 %v1319_v44  ;;  %v1327_v51 = vcombine.high %v366_v46, %v370_v47  ;;  %v373_v52 = vld [vmem:[#allocation8 + $0xc0] sm:$0xff]  ;;  %v374_v54 = vld [vmem:[#allocation8 + $0xc8] sm:$0xff]  ;;  %v1324_v56 = vcombine.low %v365_v43, %v369_v45  ;;  %vm337_vm4 = vcmask 1043456  }
  0x52   :  { %v104_v12 = vrot.slane %v93_v8, %v103_v6  ;;  %v108_v15 = vrot.slane %v100_v13, %v103_v6  ;;  %v377_v53 = vld [vmem:[#allocation8 + $0xe0] sm:$0xff]  ;;  %v378_v55 = vld [vmem:[#allocation8 + $0xe8] sm:$0xff]  ;;  %v1326_v57 = vcombine.low %v366_v46, %v370_v47  ;;  %vm340_vm5 = vcmask 1044480  }
  0x53   :  { %v1333_v58 = vcombine.high %v373_v52, %v377_v53  ;;  %v1335_v59 = vcombine.high %v374_v54, %v378_v55  ;;  %v1332_v60 = vcombine.low %v373_v52, %v377_v53  ;;  %v1334_v61 = vcombine.low %v374_v54, %v378_v55  ;;  %v1697_v62 = vld [vmem:[%s1809_s5] sm:$0x7]  ;;  %v381_v2 = vld [vmem:[#allocation8 + $0x100] sm:$0xff]  ;;  %s1587_s5 = smov [#allocation10]  }
  0x54   :  { %v111_v14 = vmul.f32 %v104_v12, %v77_v11  ;;  %v112_v17 = vmul.f32 %v108_v15, %v77_v11  ;;  %1120 = vmatpush1.bf16.msra.mxu0 %v1316_v48  ;;  %1161 = vmatpush1.bf16.msra.mxu1 %v1318_v49  ;;  %v385_v3 = vld [vmem:[#allocation8 + $0x120] sm:$0xff]  ;;  %v382_v4 = vld [vmem:[#allocation8 + $0x108] sm:$0xff]  ;;  %s1295_s28 = sshll.u32 %s1587_s5, 4  ;;  %s1296_s28 = int_to_ptr.vmem [resolvable:$true] %s1295_s28 }
  0x55   :  { %1121 = vmatprep.subr.bf16.mxu0 %v1325_v50  ;;  %1162 = vmatprep.subr.bf16.mxu1 %v1327_v51  ;;  %v1341_v5 = vcombine.high %v381_v2, %v385_v3  ;;  %v386_v6 = vld [vmem:[#allocation8 + $0x128] sm:$0xff]  ;;  %v1340_v8 = vcombine.low %v381_v2, %v385_v3  ;;  %v389_v10 = vld [vmem:[#allocation8 + $0x140] sm:$0xff]  ;;  %s1546_s29 = scalar_lea.vmem %s1296_s28, 1024  ;;  %p1551_p5 = scmp.lt.s32.totalorder %s1296_s28, %s1296_s28 }
  0x56   :  { %v114_v16 = vsel %vm113_vm0, %v111_v14, 0.0  ;;  %v117_v18 = vsel %vm113_vm0, %v112_v17, 0.0  ;;  %v1343_v7 = vcombine.high %v382_v4, %v386_v6  ;;  %v1342_v9 = vcombine.low %v382_v4, %v386_v6  ;;  %v393_v11 = vld [vmem:[#allocation8 + $0x160] sm:$0xff]  ;;  %v390_v12 = vld [vmem:[#allocation8 + $0x148] sm:$0xff]  ;;  %p1547_p4 = scmp.ne.s32.totalorder %s1296_s28, %s1546_s29  ;;  %p1552_p6 = scmp.lt.s32.totalorder %s1546_s29, %s1546_s29 }
  0x57   :  { %115 = vadd.xlane.f32.xlu0 %v114_v16  ;;  %v1349_v13 = vcombine.high %v389_v10, %v393_v11  ;;  %v394_v14 = vld [vmem:[#allocation8 + $0x168] sm:$0xff]  ;;  %v1585_v16 = vmov 1   ;;  %v1348_v17 = vcombine.low %v389_v10, %v393_v11  ;;  %v397_v20 = vld [vmem:[#allocation8 + $0x180] sm:$0xff] }
  0x58   :  { %1122 = vmatpush1.bf16.msra.mxu0 %v1324_v56  ;;  %1163 = vmatpush1.bf16.msra.mxu1 %v1326_v57  ;;  %v1351_v15 = vcombine.high %v390_v12, %v394_v14  ;;  %v405_v31 = vld [vmem:[#allocation8 + $0x1c0] sm:$0xff]  ;;  %v406_v33 = vld [vmem:[#allocation8 + $0x1c8] sm:$0xff]  ;;  %p1553_p7 = por %p1552_p6, %p1551_p5 }
  0x59   :  { %1123 = vmatprep.subr.bf16.mxu0 %v1333_v58  ;;  %1164 = vmatprep.subr.bf16.mxu1 %v1335_v59  ;;  %v409_v32 = vld [vmem:[#allocation8 + $0x1e0] sm:$0xff]  ;;  %v410_v36 = vld [vmem:[#allocation8 + $0x1e8] sm:$0xff] }
  0x5a   :  { %v1365_v35 = vcombine.high %v405_v31, %v409_v32  ;;  %v1367_v37 = vcombine.high %v406_v33, %v410_v36  ;;  %v1364_v38 = vcombine.low %v405_v31, %v409_v32  ;;  %v1366_v39 = vcombine.low %v406_v33, %v410_v36  ;;  %v413_v41 = vld [vmem:[#allocation8 + $0x200] sm:$0xff]  ;;  %v414_v43 = vld [vmem:[#allocation8 + $0x208] sm:$0xff]  ;;  %p1554_p8 = pnand %p1553_p7, %p1547_p4 }
  0x5b   :  { %118 = vadd.xlane.f32.xlu0 %v117_v18  ;;  %v1350_v18 = vcombine.low %v390_v12, %v394_v14  ;;  %v417_v42 = vld [vmem:[#allocation8 + $0x220] sm:$0xff]  ;;  %v418_v45 = vld [vmem:[#allocation8 + $0x228] sm:$0xff] }
  0x5c   :  { %1124 = vmatpush1.bf16.msra.mxu0 %v1332_v60  ;;  %1165 = vmatpush1.bf16.msra.mxu1 %v1334_v61  ;;  %v1373_v44 = vcombine.high %v413_v41, %v417_v42  ;;  %v1375_v46 = vcombine.high %v414_v43, %v418_v45  ;;  %v1372_v47 = vcombine.low %v413_v41, %v417_v42  ;;  %v421_v50 = vld [vmem:[#allocation8 + $0x240] sm:$0xff]  ;;  %v422_v51 = vld [vmem:[#allocation8 + $0x248] sm:$0xff]  ;;  %v1710_v42 = vld [vmem:[#allocation8 + $0x10] sm:$0xff] }
  0x5d   :  { %1125 = vmatprep.subr.bf16.mxu0 %v1341_v5  ;;  %1166 = vmatprep.subr.bf16.mxu1 %v1343_v7  ;;  %v1374_v48 = vcombine.low %v414_v43, %v418_v45  ;;  %v426_v53 = vld [vmem:[#allocation8 + $0x268] sm:$0xff]  ;;  %v429_v57 = vld [vmem:[#allocation8 + $0x280] sm:$0xff]  ;;  %v1712_v43 = vld [vmem:[#allocation8 + $0x30] sm:$0xff] }
  0x5e   :  { %v1383_v54 = vcombine.high %v422_v51, %v426_v53  ;;  %v1382_v56 = vcombine.low %v422_v51, %v426_v53  ;;  %v433_v58 = vld [vmem:[#allocation8 + $0x2a0] sm:$0xff]  ;;  %v430_v59 = vld [vmem:[#allocation8 + $0x288] sm:$0xff]  ;;  %v1313_v45 = vcombine.high %v1710_v42, %v1712_v43 }
  0x5f   :  { %v1389_v60 = vcombine.high %v429_v57, %v433_v58  ;;  %v434_v61 = vld [vmem:[#allocation8 + $0x2a8] sm:$0xff] }
  0x60   :  { %1126 = vmatpush1.bf16.msra.mxu0 %v1340_v8  ;;  %1167 = vmatpush1.bf16.msra.mxu1 %v1342_v9  ;;  %v438_v2 = vld [vmem:[#allocation8 + $0x2c8] sm:$0xff]  ;;  %v445_v8 = vld [vmem:[#allocation8 + $0x300] sm:$0xff] }
  0x61   :  { %1127 = vmatprep.subr.bf16.mxu0 %v1349_v13  ;;  %1168 = vmatprep.subr.bf16.mxu1 %v1351_v15  ;;  %v442_v4 = vld [vmem:[#allocation8 + $0x2e8] sm:$0xff]  ;;  %v449_v9 = vld [vmem:[#allocation8 + $0x320] sm:$0xff] }
  0x62   :  { %v1399_v5 = vcombine.high %v438_v2, %v442_v4  ;;  %v1398_v7 = vcombine.low %v438_v2, %v442_v4  ;;  %v446_v10 = vld [vmem:[#allocation8 + $0x308] sm:$0xff]  ;;  %v1405_v11 = vcombine.high %v445_v8, %v449_v9  ;;  %v1404_v13 = vcombine.low %v445_v8, %v449_v9 }
  0x63   :  { %v450_v12 = vld [vmem:[#allocation8 + $0x328] sm:$0xff] }
  0x64   :  { %1128 = vmatpush1.bf16.msra.mxu0 %v1348_v17  ;;  %1169 = vmatpush1.bf16.msra.mxu1 %v1350_v18  ;;  %v1407_v14 = vcombine.high %v446_v10, %v450_v12  ;;  %v1406_v15 = vcombine.low %v446_v10, %v450_v12  ;;  %v457_v17 = vld [vmem:[#allocation8 + $0x360] sm:$0xff]  ;;  %v454_v18 = vld [vmem:[#allocation8 + $0x348] sm:$0xff] }
  0x65   :  { %v470_v36 = vld [vmem:[#allocation8 + $0x3c8] sm:$0xff] }
  0x66   :  { %v161_v53 = vld [vmem:[#allocation5 + $0x8] sm:$0xff] }
  0xbd   :  { %v128_v22 = vpop.permute.xlu1 %127 }
  0xe4   :  { %v116_v23 = vpop.xlane.xlu0 %115 }
  0xe5   :  { %v130_v24 = vadd.f32 %v128_v22, %v116_v23  ;;  %v398_v23 = vld [vmem:[#allocation8 + $0x188] sm:$0xff] }
  0xe7   :  { %v133_v25 = vadd.f32 1.0, %v130_v24 }
  0xe8   :  { %v119_v26 = vpop.xlane.xlu0 %118 }
  0xe9   :  { %v131_v27 = vadd.f32 %v128_v22, %v119_v26  ;;  %138 = vperm.xlu1 %1448, %v133_v25   ;;  %v401_v22 = vld [vmem:[#allocation8 + $0x1a0] sm:$0xff]  ;;  %v402_v25 = vld [vmem:[#allocation8 + $0x1a8] sm:$0xff] }
  0xea   :  { %v1357_v24 = vcombine.high %v397_v20, %v401_v22  ;;  %v1359_v26 = vcombine.high %v398_v23, %v402_v25 }
  0xeb   :  { %v134_v28 = vadd.f32 1.0, %v131_v27  ;;  %v1356_v27 = vcombine.low %v397_v20, %v401_v22  ;;  %v458_v22 = vld [vmem:[#allocation8 + $0x368] sm:$0xff] }
  0xec   :  { %1129 = vmatprep.subr.bf16.mxu0 %v1357_v24  ;;  %1170 = vmatprep.subr.bf16.mxu1 %v1359_v26  ;;  %v461_v26 = vld [vmem:[#allocation8 + $0x380] sm:$0xff] }
  0xed   :  { %141 = vperm.xlu0 %1449, %v134_v28   ;;  %v1358_v28 = vcombine.low %v398_v23, %v402_v25  ;;  %1130 = vmatpush1.bf16.msra.mxu0 %v1356_v27  ;;  %v1415_v23 = vcombine.high %v454_v18, %v458_v22  ;;  %v1414_v25 = vcombine.low %v454_v18, %v458_v22  ;;  %v465_v27 = vld [vmem:[#allocation8 + $0x3a0] sm:$0xff] }
  0xee   :  { %1131 = vmatprep.subr.bf16.mxu0 %v1365_v35  ;;  %v1420_v32 = vcombine.low %v461_v26, %v465_v27  ;;  %v473_v35 = vld [vmem:[#allocation8 + $0x3e0] sm:$0xff] }
  0xef   :  { %1171 = vmatpush1.bf16.msra.mxu1 %v1358_v28  ;;  %v462_v28 = vld [vmem:[#allocation8 + $0x388] sm:$0xff] }
  0xf0   :  { %1172 = vmatprep.subr.bf16.mxu1 %v1367_v37 }
  0xf1   :  { %1457 = vset.pattern.permute.xlu0 %v1584_v29  ;;  %1132 = vmatpush1.bf16.msra.mxu0 %v1364_v38  ;;  %v474_v38 = vld [vmem:[#allocation8 + $0x3e8] sm:$0xff] }
  0xf2   :  { %1133 = vmatprep.subr.bf16.mxu0 %v1373_v44  ;;  %v1430_v41 = vcombine.low %v470_v36, %v474_v38  ;;  %v1714_v44 = vld [vmem:[#allocation8 + $0x18] sm:$0xff] }
  0xf3   :  { %1173 = vmatpush1.bf16.msra.mxu1 %v1366_v39  ;;  %v1431_v39 = vcombine.high %v470_v36, %v474_v38 }
  0xf4   :  { %1174 = vmatprep.subr.bf16.mxu1 %v1375_v46  ;;  %v1718_v46 = vld [vmem:[#allocation8 + $0x38] sm:$0xff] }
  0xf5   :  { %1134 = vmatpush1.bf16.msra.mxu0 %v1372_v47  ;;  %v1312_v47 = vcombine.low %v1710_v42, %v1712_v43 }
  0xf7   :  { %1175 = vmatpush1.bf16.msra.mxu1 %v1374_v48  ;;  %v1314_v48 = vcombine.low %v1714_v44, %v1718_v46 }
  0xf8   :  { %1176 = vmatprep.subr.bf16.mxu1 %v1383_v54 }
  0xfb   :  { %1177 = vmatpush1.bf16.msra.mxu1 %v1382_v56 }
 0x168   :  { %v139_v63 = vpop.permute.xlu1 %138 }
 0x169   :  { %v148_v0 = vrot.slane %v139_v63, %v1691_v21  ;;  %v1390_v63 = vcombine.low %v430_v59, %v434_v61 }
 0x16b   :  { %v158_v1 = vmul.f32 %v148_v0, %v1697_v62  ;;  %v437_v0 = vld [vmem:[#allocation8 + $0x2c0] sm:$0xff] }
 0x16c   :  { %v142_v34 = vpop.permute.xlu0 %141 }
 0x16d   :  { %164 = vperm.xlu1 %1448, %v158_v1   ;;  %v152_v40 = vrot.slane %v142_v34, %v1691_v21  ;;  %v425_v21 = vld [vmem:[#allocation8 + $0x260] sm:$0xff] }
 0x16e   :  { %v1381_v52 = vcombine.high %v421_v50, %v425_v21  ;;  %v1380_v55 = vcombine.low %v421_v50, %v425_v21  ;;  %v469_v34 = vld [vmem:[#allocation8 + $0x3c0] sm:$0xff] }
 0x16f   :  { %v159_v49 = vmul.f32 %v152_v40, %v1697_v62  ;;  %v1391_v62 = vcombine.high %v430_v59, %v434_v61  ;;  %v1429_v37 = vcombine.high %v469_v34, %v473_v35  ;;  %v1428_v40 = vcombine.low %v469_v34, %v473_v35 }
 0x170   :  { %1135 = vmatprep.subr.bf16.mxu0 %v1381_v52  ;;  %v160_v52 = vld [vmem:[#allocation5] sm:$0xff]  ;;  %v1732_v59 = vrot.slane %v161_v53, 6  ;;  %v1736_v61 = vrot.slane %v161_v53, 2 }
 0x171   :  { %1450 = vset.pattern.permute.xlu1 %v1585_v16  ;;  %1136 = vmatpush1.bf16.msra.mxu0 %v1380_v55  ;;  %v175_v54 = vrot.slane %v160_v52, 1  ;;  %v176_v55 = vrot.slane %v161_v53, 1  ;;  %v1726_v56 = vrot.slane %v160_v52, 7  ;;  %v1738_v2 = vrot.slane %v160_v52, 4 }
 0x172   :  { %170 = vperm.xlu1 %1450, %v158_v1   ;;  %1137 = vmatprep.subr.bf16.mxu0 %v1389_v60  ;;  %v1734_v60 = vrot.slane %v160_v52, 2  ;;  %v1742_v4 = vrot.slane %v160_v52, 5 }
 0x173   :  { %1178 = vmatprep.subr.bf16.mxu1 %v1391_v62 }
 0x174   :  { %1179 = vmatpush1.bf16.msra.mxu1 %v1390_v63 }
 0x175   :  { %1180 = vmatprep.subr.bf16.mxu1 %v1399_v5  ;;  %v1744_v5 = vrot.slane %v161_v53, 5 }
 0x176   :  { %1451 = vset.pattern.permute.xlu1 %v1586_v30 }
 0x177   :  { %184 = vperm.xlu1 %1451, %v158_v1  }
 0x178   :  { %1181 = vmatpush1.bf16.msra.mxu1 %v1398_v7 }
 0x179   :  { %1182 = vmatprep.subr.bf16.mxu1 %v1407_v14 }
 0x17b   :  { %1452 = vset.pattern.permute.xlu1 %v1584_v29 }
 0x17c   :  { %196 = vperm.xlu1 %1452, %v158_v1   ;;  %v441_v1 = vld [vmem:[#allocation8 + $0x2e0] sm:$0xff]  ;;  %1183 = vmatpush1.bf16.msra.mxu1 %v1406_v15 }
 0x17d   :  { %v1397_v3 = vcombine.high %v437_v0, %v441_v1  ;;  %v1396_v6 = vcombine.low %v437_v0, %v441_v1  ;;  %1184 = vmatprep.subr.bf16.mxu1 %v1415_v23  ;;  %v199_v0 = vrot.slane %v160_v52, 3  ;;  %v200_v1 = vrot.slane %v161_v53, 3 }
 0x180   :  { %1453 = vset.pattern.permute.xlu1 %v1583_v19  ;;  %v1388_v19 = vcombine.low %v429_v57, %v433_v58  ;;  %1185 = vmatpush1.bf16.msra.mxu1 %v1414_v25  ;;  %v1728_v57 = vrot.slane %v161_v53, 7  ;;  %v1730_v58 = vrot.slane %v160_v52, 6 }
 0x181   :  { %245 = vperm.xlu1 %1453, %v159_v49  }
 0x182   :  { %1138 = vmatpush1.bf16.msra.mxu0 %v1388_v19 }
 0x183   :  { %1139 = vmatprep.subr.bf16.mxu0 %v1397_v3  ;;  %v1740_v3 = vrot.slane %v161_v53, 4 }
 0x185   :  { %1454 = vset.pattern.permute.xlu1 %v1585_v16  ;;  %v453_v16 = vld [vmem:[#allocation8 + $0x340] sm:$0xff] }
 0x186   :  { %255 = vperm.xlu1 %1454, %v159_v49   ;;  %1140 = vmatpush1.bf16.msra.mxu0 %v1396_v6  ;;  %v1413_v20 = vcombine.high %v453_v16, %v457_v17  ;;  %v1412_v24 = vcombine.low %v453_v16, %v457_v17 }
 0x187   :  { %1141 = vmatprep.subr.bf16.mxu0 %v1405_v11 }
 0x18a   :  { %1455 = vset.pattern.permute.xlu1 %v1586_v30  ;;  %1142 = vmatpush1.bf16.msra.mxu0 %v1404_v13  ;;  %v1421_v30 = vcombine.high %v461_v26, %v465_v27 }
 0x18b   :  { %267 = vperm.xlu1 %1455, %v159_v49   ;;  %1143 = vmatprep.subr.bf16.mxu0 %v1413_v20 }
 0x18e   :  { %1144 = vmatpush1.bf16.msra.mxu0 %v1412_v24 }
 0x18f   :  { %1456 = vset.pattern.permute.xlu1 %v1584_v29  ;;  %v466_v29 = vld [vmem:[#allocation8 + $0x3a8] sm:$0xff]  ;;  %1145 = vmatprep.subr.bf16.mxu0 %v1421_v30 }
 0x190   :  { %275 = vperm.xlu1 %1456, %v159_v49   ;;  %v1423_v31 = vcombine.high %v462_v28, %v466_v29  ;;  %v1422_v33 = vcombine.low %v462_v28, %v466_v29  ;;  %v1315_v49 = vcombine.high %v1714_v44, %v1718_v46 }
 0x192   :  { %1186 = vmatprep.subr.bf16.mxu1 %v1423_v31  ;;  %1146 = vmatpush1.bf16.msra.mxu0 %v1420_v32 }
 0x193   :  { %1187 = vmatpush1.bf16.msra.mxu1 %v1422_v33  ;;  %1147 = vmatprep.subr.bf16.mxu0 %v1429_v37 }
 0x194   :  { %1188 = vmatprep.subr.bf16.mxu1 %v1431_v39 }
 0x196   :  { %1148 = vmatpush1.bf16.msra.mxu0 %v1428_v40 }
 0x197   :  { %1189 = vmatpush1.bf16.msra.mxu1 %v1430_v41  ;;  %1199 = vmatprep.subr.bf16.mxu0 %v1313_v45 }
 0x198   :  { %1240 = vmatprep.subr.bf16.mxu1 %v1315_v49 }
 0x1ec   :  { %v165_v50 = vpop.permute.xlu1 %164 }
 0x1ed   :  { %v167_v6 = vmul.f32 %v165_v50, %v160_v52  ;;  %v168_v7 = vmul.f32 %v165_v50, %v161_v53  ;;  %v211_v10 = vmul.f32 %v1726_v56, %v165_v50  ;;  %v212_v11 = vmul.f32 %v1728_v57, %v165_v50 }
 0x1ee   :  { %v229_v12 = vmul.f32 %v1730_v58, %v165_v50  ;;  %v230_v13 = vmul.f32 %v1732_v59, %v165_v50 }
 0x1f1   :  { %v171_v21 = vpop.permute.xlu1 %170 }
 0x1f2   :  { %v179_v19 = vmul.f32 %v175_v54, %v171_v21  ;;  %v180_v63 = vmul.f32 %v176_v55, %v171_v21  ;;  %v213_v8 = vmul.f32 %v171_v21, %v160_v52  ;;  %v214_v9 = vmul.f32 %v171_v21, %v161_v53 }
 0x1f3   :  { %v231_v16 = vmul.f32 %v1726_v56, %v171_v21  ;;  %v232_v17 = vmul.f32 %v1728_v57, %v171_v21 }
 0x1f4   :  { %v181_v14 = vadd.f32 %v179_v19, %v167_v6  ;;  %v182_v15 = vadd.f32 %v180_v63, %v168_v7  ;;  %v215_v25 = vadd.f32 %v213_v8, %v211_v10  ;;  %v216_v26 = vadd.f32 %v214_v9, %v212_v11 }
 0x1f5   :  { %v233_v33 = vadd.f32 %v231_v16, %v229_v12  ;;  %v234_v34 = vadd.f32 %v232_v17, %v230_v13 }
 0x1f6   :  { %v185_v51 = vpop.permute.xlu1 %184 }
 0x1f7   :  { %v191_v20 = vmul.f32 %v1734_v60, %v185_v51  ;;  %v192_v22 = vmul.f32 %v1736_v61, %v185_v51  ;;  %v217_v23 = vmul.f32 %v185_v51, %v175_v54  ;;  %v218_v24 = vmul.f32 %v185_v51, %v176_v55 }
 0x1f8   :  { %v235_v27 = vmul.f32 %v185_v51, %v160_v52  ;;  %v236_v28 = vmul.f32 %v185_v51, %v161_v53 }
 0x1f9   :  { %v193_v37 = vadd.f32 %v191_v20, %v181_v14  ;;  %v194_v38 = vadd.f32 %v192_v22, %v182_v15  ;;  %v219_v39 = vadd.f32 %v217_v23, %v215_v25  ;;  %v220_v40 = vadd.f32 %v218_v24, %v216_v26 }
 0x1fa   :  { %v237_v45 = vadd.f32 %v235_v27, %v233_v33  ;;  %v238_v49 = vadd.f32 %v236_v28, %v234_v34 }
 0x1fb   :  { %v197_v62 = vpop.permute.xlu1 %196 }
 0x1fc   :  { %v203_v30 = vmul.f32 %v199_v0, %v197_v62  ;;  %v204_v29 = vmul.f32 %v200_v1, %v197_v62  ;;  %v221_v31 = vmul.f32 %v197_v62, %v1734_v60  ;;  %v222_v32 = vmul.f32 %v197_v62, %v1736_v61 }
 0x1fd   :  { %v239_v35 = vmul.f32 %v197_v62, %v175_v54  ;;  %v240_v36 = vmul.f32 %v197_v62, %v176_v55 }
 0x1fe   :  { %v205_v50 = vadd.f32 %v203_v30, %v193_v37  ;;  %v206_v21 = vadd.f32 %v204_v29, %v194_v38  ;;  %v223_v51 = vadd.f32 %v221_v31, %v219_v39  ;;  %v224_v52 = vadd.f32 %v222_v32, %v220_v40 }
 0x1ff   :  { %v241_v53 = vadd.f32 %v239_v35, %v237_v45  ;;  %v242_v19 = vadd.f32 %v240_v36, %v238_v49 }
 0x200   :  { %v246_v18 = vpop.permute.xlu1 %245  ;;  %v330_v28 = vsel %vm328_vm1, %v206_v21, %v224_v52  ;;  %v329_v30 = vsel %vm328_vm1, %v205_v50, %v223_v51  ;;  %v344_v52 = vld [vmem:[#allocation7 + $0x8] sm:$0x3f] }
 0x201   :  { %v252_v54 = vmul.f32 %v1738_v2, %v246_v18  ;;  %v253_v55 = vmul.f32 %v1740_v3, %v246_v18  ;;  %v282_v8 = vmul.f32 %v246_v18, %v199_v0  ;;  %v283_v9 = vmul.f32 %v246_v18, %v200_v1 }
 0x202   :  { %v296_v17 = vmul.f32 %v246_v18, %v1734_v60  ;;  %v297_v20 = vmul.f32 %v246_v18, %v1736_v61  ;;  %v332_v21 = vsel %vm331_vm2, %v329_v30, %v241_v53  ;;  %v367_v53 = vld [vmem:[#allocation8 + $0x90] sm:$0xff]  ;;  %v384_v30 = vld [vmem:[#allocation8 + $0x118] sm:$0xff] }
 0x205   :  { %v256_v41 = vpop.permute.xlu1 %255 }
 0x206   :  { %v262_v63 = vmul.f32 %v1742_v4, %v256_v41  ;;  %v263_v6 = vmul.f32 %v1744_v5, %v256_v41  ;;  %v284_v62 = vmul.f32 %v256_v41, %v1738_v2  ;;  %v285_v7 = vmul.f32 %v256_v41, %v1740_v3 }
 0x207   :  { %v298_v10 = vmul.f32 %v256_v41, %v199_v0  ;;  %v299_v11 = vmul.f32 %v256_v41, %v200_v1 }
 0x208   :  { %v264_v22 = vadd.f32 %v262_v63, %v252_v54  ;;  %v265_v23 = vadd.f32 %v263_v6, %v253_v55  ;;  %v286_v24 = vadd.f32 %v284_v62, %v282_v8  ;;  %v287_v25 = vadd.f32 %v285_v7, %v283_v9  ;;  %v343_v6 = vld [vmem:[#allocation7] sm:$0x3f] }
 0x209   :  { %v300_v26 = vadd.f32 %v298_v10, %v296_v17  ;;  %v301_v27 = vadd.f32 %v299_v11, %v297_v20  ;;  %v359_v10 = vld [vmem:[#allocation8 + $0x50] sm:$0xff]  ;;  %v368_v20 = vld [vmem:[#allocation8 + $0x98] sm:$0xff] }
 0x20a   :  { %v268_v12 = vpop.permute.xlu1 %267  ;;  %v363_v11 = vld [vmem:[#allocation8 + $0x70] sm:$0xff] }
 0x20b   :  { %v270_v13 = vmul.f32 %v268_v12, %v1730_v58  ;;  %v271_v14 = vmul.f32 %v268_v12, %v1732_v59  ;;  %v288_v15 = vmul.f32 %v268_v12, %v1742_v4  ;;  %v289_v16 = vmul.f32 %v268_v12, %v1744_v5  ;;  %v371_v17 = vld [vmem:[#allocation8 + $0xb0] sm:$0xff] }
 0x20c   :  { %v302_v0 = vmul.f32 %v268_v12, %v1738_v2  ;;  %v303_v1 = vmul.f32 %v268_v12, %v1740_v3  ;;  %v360_v12 = vld [vmem:[#allocation8 + $0x58] sm:$0xff]  ;;  %v1328_v42 = vcombine.low %v367_v53, %v371_v17 }
 0x20d   :  { %v272_v29 = vadd.f32 %v270_v13, %v264_v22  ;;  %v273_v31 = vadd.f32 %v271_v14, %v265_v23  ;;  %v290_v32 = vadd.f32 %v288_v15, %v286_v24  ;;  %v291_v60 = vadd.f32 %v289_v16, %v287_v25  ;;  %v364_v13 = vld [vmem:[#allocation8 + $0x78] sm:$0xff] }
 0x20e   :  { %v304_v3 = vadd.f32 %v302_v0, %v300_v26  ;;  %v305_v35 = vadd.f32 %v303_v1, %v301_v27  ;;  %v1321_v15 = vcombine.high %v359_v10, %v363_v11  ;;  %v1323_v16 = vcombine.high %v360_v12, %v364_v13  ;;  %v372_v22 = vld [vmem:[#allocation8 + $0xb8] sm:$0xff]  ;;  %v375_v1 = vld [vmem:[#allocation8 + $0xd0] sm:$0xff] }
 0x20f   :  { %v276_v33 = vpop.permute.xlu1 %275  ;;  %v1320_v23 = vcombine.low %v359_v10, %v363_v11  ;;  %v1322_v24 = vcombine.low %v360_v12, %v364_v13  ;;  %v1329_v25 = vcombine.high %v367_v53, %v371_v17  ;;  %v1331_v0 = vcombine.high %v368_v20, %v372_v22  ;;  %v379_v26 = vld [vmem:[#allocation8 + $0xf0] sm:$0xff]  ;;  %v376_v27 = vld [vmem:[#allocation8 + $0xd8] sm:$0xff] }
 0x210   :  { %v278_v61 = vmul.f32 %v276_v33, %v1726_v56  ;;  %v279_v18 = vmul.f32 %v276_v33, %v1728_v57  ;;  %v292_v34 = vmul.f32 %v276_v33, %v1730_v58  ;;  %v293_v2 = vmul.f32 %v276_v33, %v1732_v59  ;;  %v423_v10 = vld [vmem:[#allocation8 + $0x250] sm:$0xff]  ;;  %v424_v12 = vld [vmem:[#allocation8 + $0x258] sm:$0xff] }
 0x211   :  { %v306_v36 = vmul.f32 %v276_v33, %v1742_v4  ;;  %v307_v37 = vmul.f32 %v276_v33, %v1744_v5  ;;  %v333_v59 = vsel %vm331_vm2, %v330_v28, %v242_v19  ;;  %v380_v28 = vld [vmem:[#allocation8 + $0xf8] sm:$0xff]  ;;  %v1330_v43 = vcombine.low %v368_v20, %v372_v22  ;;  %v427_v11 = vld [vmem:[#allocation8 + $0x270] sm:$0xff] }
 0x212   :  { %v280_v38 = vadd.f32 %v278_v61, %v272_v29  ;;  %v281_v39 = vadd.f32 %v279_v18, %v273_v31  ;;  %v294_v40 = vadd.f32 %v292_v34, %v290_v32  ;;  %v295_v41 = vadd.f32 %v293_v2, %v291_v60  ;;  %v388_v29 = vld [vmem:[#allocation8 + $0x138] sm:$0xff]  ;;  %v391_v61 = vld [vmem:[#allocation8 + $0x150] sm:$0xff] }
 0x213   :  { %v308_v45 = vadd.f32 %v306_v36, %v304_v3  ;;  %v309_v49 = vadd.f32 %v307_v37, %v305_v35  ;;  %v1337_v44 = vcombine.high %v375_v1, %v379_v26  ;;  %v1339_v46 = vcombine.high %v376_v27, %v380_v28  ;;  %v395_v18 = vld [vmem:[#allocation8 + $0x170] sm:$0xff]  ;;  %v392_v34 = vld [vmem:[#allocation8 + $0x158] sm:$0xff] }
 0x214   :  { %v312_v56 = vrot.slane %v280_v38, 5  ;;  %v313_v57 = vrot.slane %v281_v39, 5  ;;  %v318_v50 = vrot.slane %v294_v40, 5  ;;  %v319_v58 = vrot.slane %v295_v41, 5  ;;  %v396_v2 = vld [vmem:[#allocation8 + $0x178] sm:$0xff]  ;;  %v399_v38 = vld [vmem:[#allocation8 + $0x190] sm:$0xff] }
 0x215   :  { %v324_v4 = vrot.slane %v308_v45, 5  ;;  %v325_v51 = vrot.slane %v309_v49, 5  ;;  %v1336_v31 = vcombine.low %v375_v1, %v379_v26  ;;  %v1338_v32 = vcombine.low %v376_v27, %v380_v28  ;;  %v403_v39 = vld [vmem:[#allocation8 + $0x1b0] sm:$0xff]  ;;  %v400_v40 = vld [vmem:[#allocation8 + $0x198] sm:$0xff] }
 0x216   :  { %v336_v5 = vsel %vm334_vm3, %v333_v59, %v313_v57  ;;  %v335_v63 = vsel %vm334_vm3, %v332_v21, %v312_v56  ;;  %v1347_v33 = vcombine.high %v384_v30, %v388_v29  ;;  %v1346_v35 = vcombine.low %v384_v30, %v388_v29  ;;  %v404_v41 = vld [vmem:[#allocation8 + $0x1b8] sm:$0xff]  ;;  %v431_v17 = vld [vmem:[#allocation8 + $0x290] sm:$0xff] }
 0x217   :  { %v339_v54 = vsel %vm337_vm4, %v336_v5, %v319_v58  ;;  %v338_v55 = vsel %vm337_vm4, %v335_v63, %v318_v50  ;;  %v1353_v36 = vcombine.high %v391_v61, %v395_v18  ;;  %v1355_v37 = vcombine.high %v392_v34, %v396_v2  ;;  %v407_v50 = vld [vmem:[#allocation8 + $0x1d0] sm:$0xff]  ;;  %v408_v59 = vld [vmem:[#allocation8 + $0x1d8] sm:$0xff] }
 0x218   :  { %v342_v62 = vsel %vm340_vm5, %v339_v54, %v325_v51  ;;  %v341_v7 = vsel %vm340_vm5, %v338_v55, %v324_v4  ;;  %v1352_v45 = vcombine.low %v391_v61, %v395_v18  ;;  %v1354_v49 = vcombine.low %v392_v34, %v396_v2  ;;  %v411_v58 = vld [vmem:[#allocation8 + $0x1f0] sm:$0xff]  ;;  %v412_v21 = vld [vmem:[#allocation8 + $0x1f8] sm:$0xff] }
 0x219   :  { %v346_v8 = vadd.f32 %v344_v52, %v342_v62  ;;  %v345_v9 = vadd.f32 %v343_v6, %v341_v7  ;;  %v1361_v56 = vcombine.high %v399_v38, %v403_v39  ;;  %v1363_v57 = vcombine.high %v400_v40, %v404_v41  ;;  %v415_v63 = vld [vmem:[#allocation8 + $0x210] sm:$0xff]  ;;  %v416_v54 = vld [vmem:[#allocation8 + $0x218] sm:$0xff] }
 0x21a   :  { %v1360_v4 = vcombine.low %v399_v38, %v403_v39  ;;  %v1362_v51 = vcombine.low %v400_v40, %v404_v41  ;;  %v1369_v5 = vcombine.high %v407_v50, %v411_v58  ;;  %v1371_v52 = vcombine.high %v408_v59, %v412_v21  ;;  %v419_v6 = vld [vmem:[#allocation8 + $0x230] sm:$0xff]  ;;  %v420_v55 = vld [vmem:[#allocation8 + $0x238] sm:$0xff] }
 0x21b   :  { %v348_v19 = vpack.c.bf16 %v346_v8, %v346_v8  ;;  %v1780_v14 = vpack.c.bf16 %v345_v9, %v345_v9  ;;  %v1368_v62 = vcombine.low %v407_v50, %v411_v58  ;;  %v1370_v7 = vcombine.low %v408_v59, %v412_v21  ;;  %v428_v13 = vld [vmem:[#allocation8 + $0x278] sm:$0xff]  ;;  %v435_v20 = vld [vmem:[#allocation8 + $0x2b0] sm:$0xff] }
 0x21c   :  { %v1377_v8 = vcombine.high %v415_v63, %v419_v6  ;;  %v1379_v9 = vcombine.high %v416_v54, %v420_v55  ;;  %v1378_v53 = vcombine.low %v416_v54, %v420_v55  ;;  %v432_v22 = vld [vmem:[#allocation8 + $0x298] sm:$0xff]  ;;  %v439_v26 = vld [vmem:[#allocation8 + $0x2d0] sm:$0xff] }
 0x21d   :  { %1149 = vmatprep.mubr.bf16.mxu0 %v348_v19  ;;  %1190 = vmatprep.mubr.bf16.mxu1 %v348_v19  ;;  %v443_v27 = vld [vmem:[#allocation8 + $0x2f0] sm:$0xff]  ;;  %v440_v28 = vld [vmem:[#allocation8 + $0x2d8] sm:$0xff] }
 0x21e   :  { %1150 = vmatmul.mubr.bf16.vlgmr.msra.gmra.mrb[0].mxu0 %v1780_v14  ;;  %1191 = vmatmul.mubr.bf16.vlgmr.msra.gmra.mrb[0].mxu1 %v1780_v14  ;;  %v451_v30 = vld [vmem:[#allocation8 + $0x330] sm:$0xff]  ;;  %v448_v29 = vld [vmem:[#allocation8 + $0x318] sm:$0xff] }
 0x21f   :  { %1200 = vmatpush1.bf16.msra.mxu0 %v1312_v47  ;;  %1241 = vmatpush1.bf16.msra.mxu1 %v1314_v48  ;;  %v383_v47 = vld [vmem:[#allocation8 + $0x110] sm:$0xff]  ;;  %v456_v2 = vld [vmem:[#allocation8 + $0x358] sm:$0xff] }
 0x220   :  { %1231 = vmatprep.mubr.bf16.mxu0 %v348_v19  ;;  %1272 = vmatprep.mubr.bf16.mxu1 %v348_v19  ;;  %v387_v48 = vld [vmem:[#allocation8 + $0x130] sm:$0xff]  ;;  %v1376_v19 = vcombine.low %v415_v63, %v419_v6  ;;  %v464_v41 = vld [vmem:[#allocation8 + $0x398] sm:$0xff] }
 0x221   :  { %1201 = vmatprep.subr.bf16.mxu0 %v1321_v15  ;;  %1242 = vmatprep.subr.bf16.mxu1 %v1323_v16  ;;  %v1345_v60 = vcombine.high %v383_v47, %v387_v48  ;;  %v1344_v3 = vcombine.low %v383_v47, %v387_v48  ;;  %v1385_v15 = vcombine.high %v423_v10, %v427_v11  ;;  %v447_v48 = vld [vmem:[#allocation8 + $0x310] sm:$0xff]  ;;  %v472_v21 = vld [vmem:[#allocation8 + $0x3d8] sm:$0xff] }
 0x222   :  { %v1387_v16 = vcombine.high %v424_v12, %v428_v13  ;;  %v455_v18 = vld [vmem:[#allocation8 + $0x350] sm:$0xff] }
 0x223   :  { %1202 = vmatpush1.bf16.msra.mxu0 %v1320_v23  ;;  %1243 = vmatpush1.bf16.msra.mxu1 %v1322_v24  ;;  %v436_v23 = vld [vmem:[#allocation8 + $0x2b8] sm:$0xff]  ;;  %v1384_v24 = vcombine.low %v423_v10, %v427_v11  ;;  %v459_v34 = vld [vmem:[#allocation8 + $0x370] sm:$0xff] }
 0x224   :  { %1203 = vmatprep.subr.bf16.mxu0 %v1329_v25  ;;  %1244 = vmatprep.subr.bf16.mxu1 %v1331_v0  ;;  %v1386_v25 = vcombine.low %v424_v12, %v428_v13  ;;  %v1393_v0 = vcombine.high %v431_v17, %v435_v20  ;;  %v1395_v1 = vcombine.high %v432_v22, %v436_v23  ;;  %v463_v39 = vld [vmem:[#allocation8 + $0x390] sm:$0xff] }
 0x225   :  { %v467_v40 = vld [vmem:[#allocation8 + $0x3b0] sm:$0xff] }
 0x226   :  { %v471_v58 = vld [vmem:[#allocation8 + $0x3d0] sm:$0xff] }
 0x227   :  { %1204 = vmatpush1.bf16.msra.mxu0 %v1328_v42  ;;  %1245 = vmatpush1.bf16.msra.mxu1 %v1330_v43  ;;  %v444_v42 = vld [vmem:[#allocation8 + $0x2f8] sm:$0xff]  ;;  %v1392_v43 = vcombine.low %v431_v17, %v435_v20  ;;  %v475_v59 = vld [vmem:[#allocation8 + $0x3f0] sm:$0xff] }
 0x228   :  { %1205 = vmatprep.subr.bf16.mxu0 %v1337_v44  ;;  %1246 = vmatprep.subr.bf16.mxu1 %v1339_v46  ;;  %v1394_v44 = vcombine.low %v432_v22, %v436_v23  ;;  %v1401_v46 = vcombine.high %v439_v26, %v443_v27  ;;  %v1403_v47 = vcombine.high %v440_v28, %v444_v42 }
 0x229   :  { %v1432_v6 = vcombine.low %v471_v58, %v475_v59 }
 0x22b   :  { %1206 = vmatpush1.bf16.msra.mxu0 %v1336_v31  ;;  %1247 = vmatpush1.bf16.msra.mxu1 %v1338_v32  ;;  %v452_v31 = vld [vmem:[#allocation8 + $0x338] sm:$0xff]  ;;  %v1400_v32 = vcombine.low %v439_v26, %v443_v27 }
 0x22c   :  { %1207 = vmatprep.subr.bf16.mxu0 %v1345_v60  ;;  %1248 = vmatprep.subr.bf16.mxu1 %v1347_v33  ;;  %v1402_v60 = vcombine.low %v440_v28, %v444_v42  ;;  %v1409_v33 = vcombine.high %v447_v48, %v451_v30  ;;  %v1411_v61 = vcombine.high %v448_v29, %v452_v31 }
 0x22f   :  { %1208 = vmatpush1.bf16.msra.mxu0 %v1344_v3  ;;  %1249 = vmatpush1.bf16.msra.mxu1 %v1346_v35  ;;  %v460_v3 = vld [vmem:[#allocation8 + $0x378] sm:$0xff]  ;;  %v1408_v35 = vcombine.low %v447_v48, %v451_v30 }
 0x230   :  { %1209 = vmatprep.subr.bf16.mxu0 %v1353_v36  ;;  %1250 = vmatprep.subr.bf16.mxu1 %v1355_v37  ;;  %v1410_v36 = vcombine.low %v448_v29, %v452_v31  ;;  %v1417_v37 = vcombine.high %v455_v18, %v459_v34  ;;  %v1419_v38 = vcombine.high %v456_v2, %v460_v3 }
 0x233   :  { %1210 = vmatpush1.bf16.msra.mxu0 %v1352_v45  ;;  %1251 = vmatpush1.bf16.msra.mxu1 %v1354_v49  ;;  %v468_v45 = vld [vmem:[#allocation8 + $0x3b8] sm:$0xff]  ;;  %v1416_v49 = vcombine.low %v455_v18, %v459_v34 }
 0x234   :  { %1211 = vmatprep.subr.bf16.mxu0 %v1361_v56  ;;  %1252 = vmatprep.subr.bf16.mxu1 %v1363_v57  ;;  %v1418_v56 = vcombine.low %v456_v2, %v460_v3  ;;  %v1425_v57 = vcombine.high %v463_v39, %v467_v40  ;;  %v1427_v50 = vcombine.high %v464_v41, %v468_v45 }
 0x237   :  { %1212 = vmatpush1.bf16.msra.mxu0 %v1360_v4  ;;  %1253 = vmatpush1.bf16.msra.mxu1 %v1362_v51  ;;  %v476_v4 = vld [vmem:[#allocation8 + $0x3f8] sm:$0xff]  ;;  %v1424_v51 = vcombine.low %v463_v39, %v467_v40 }
 0x238   :  { %1213 = vmatprep.subr.bf16.mxu0 %v1369_v5  ;;  %1254 = vmatprep.subr.bf16.mxu1 %v1371_v52  ;;  %v1426_v5 = vcombine.low %v464_v41, %v468_v45  ;;  %v1433_v52 = vcombine.high %v471_v58, %v475_v59  ;;  %v1435_v63 = vcombine.high %v472_v21, %v476_v4 }
 0x239   :  { %v1434_v54 = vcombine.low %v472_v21, %v476_v4 }
 0x23b   :  { %1214 = vmatpush1.bf16.msra.mxu0 %v1368_v62  ;;  %1255 = vmatpush1.bf16.msra.mxu1 %v1370_v7 }
 0x23c   :  { %1215 = vmatprep.subr.bf16.mxu0 %v1377_v8  ;;  %1256 = vmatprep.subr.bf16.mxu1 %v1379_v9 }
 0x23f   :  { %1216 = vmatpush1.bf16.msra.mxu0 %v1376_v19  ;;  %1257 = vmatpush1.bf16.msra.mxu1 %v1378_v53 }
 0x240   :  { %1217 = vmatprep.subr.bf16.mxu0 %v1385_v15  ;;  %1258 = vmatprep.subr.bf16.mxu1 %v1387_v16 }
 0x243   :  { %1218 = vmatpush1.bf16.msra.mxu0 %v1384_v24  ;;  %1259 = vmatpush1.bf16.msra.mxu1 %v1386_v25 }
 0x244   :  { %1219 = vmatprep.subr.bf16.mxu0 %v1393_v0  ;;  %1260 = vmatprep.subr.bf16.mxu1 %v1395_v1 }
 0x247   :  { %1220 = vmatpush1.bf16.msra.mxu0 %v1392_v43  ;;  %1261 = vmatpush1.bf16.msra.mxu1 %v1394_v44 }
 0x248   :  { %1221 = vmatprep.subr.bf16.mxu0 %v1401_v46  ;;  %1262 = vmatprep.subr.bf16.mxu1 %v1403_v47 }
 0x24b   :  { %1222 = vmatpush1.bf16.msra.mxu0 %v1400_v32  ;;  %1263 = vmatpush1.bf16.msra.mxu1 %v1402_v60 }
 0x24c   :  { %1223 = vmatprep.subr.bf16.mxu0 %v1409_v33  ;;  %1264 = vmatprep.subr.bf16.mxu1 %v1411_v61 }
 0x24f   :  { %1224 = vmatpush1.bf16.msra.mxu0 %v1408_v35  ;;  %1265 = vmatpush1.bf16.msra.mxu1 %v1410_v36 }
 0x250   :  { %1225 = vmatprep.subr.bf16.mxu0 %v1417_v37  ;;  %1266 = vmatprep.subr.bf16.mxu1 %v1419_v38 }
 0x253   :  { %1226 = vmatpush1.bf16.msra.mxu0 %v1416_v49  ;;  %1267 = vmatpush1.bf16.msra.mxu1 %v1418_v56 }
 0x254   :  { %1227 = vmatprep.subr.bf16.mxu0 %v1425_v57  ;;  %1268 = vmatprep.subr.bf16.mxu1 %v1427_v50 }
 0x257   :  { %1228 = vmatpush1.bf16.msra.mxu0 %v1424_v51  ;;  %1269 = vmatpush1.bf16.msra.mxu1 %v1426_v5 }
 0x258   :  { %1229 = vmatprep.subr.bf16.mxu0 %v1433_v52  ;;  %1270 = vmatprep.subr.bf16.mxu1 %v1435_v63 }
 0x25b   :  { %1230 = vmatpush1.bf16.msra.mxu0 %v1432_v6  ;;  %1271 = vmatpush1.bf16.msra.mxu1 %v1434_v54 }
 0x25e   :  { %1232 = vmatmul.mubr.bf16.vlgmr.msra.gmra.mrb[4].mxu0 %v1780_v14  ;;  %1273 = vmatmul.mubr.bf16.vlgmr.msra.gmra.mrb[4].mxu1 %v1780_v14 }
 0x2f1   :  { %v1151_v55 = vpop.f32.mrb[0].mxu0  ;;  %v1192_v62 = vpop.f32.mrb[0].mxu1 }
 0x2f2   :  { %1281 = vst [vmem:[#allocation10] sm:$0x3f] %v1151_v55  ;;  %1283 = vst [vmem:[#allocation10 + $0x10] sm:$0x3f] %v1192_v62  ;;  %v1153_v7 = vpop.f32.mrb[1].mxu0  ;;  %v1194_v8 = vpop.f32.mrb[1].mxu1 }
 0x2f3   :  { %1282 = vst [vmem:[#allocation10 + $0x8] sm:$0x3f] %v1153_v7  ;;  %1284 = vst [vmem:[#allocation10 + $0x18] sm:$0x3f] %v1194_v8  ;;  %v1155_v9 = vpop.f32.mrb[2].mxu0  ;;  %v1196_v10 = vpop.f32.mrb[2].mxu1 }
 0x2f4   :  { %v1156_v11 = vpop.f32.mrb[3].mxu0  ;;  %v1197_v12 = vpop.f32.mrb[3].mxu1 }
 0x331   :  { %v1233_v13 = vpop.f32.mrb[4].mxu0  ;;  %v1274_v19 = vpop.f32.mrb[4].mxu1 }
 0x332   :  { %1285 = vst [vmem:[#allocation10 + $0x20] sm:$0x3f] %v1233_v13  ;;  %1287 = vst [vmem:[#allocation10 + $0x30] sm:$0x3f] %v1274_v19  ;;  %v1235_v14 = vpop.f32.mrb[5].mxu0  ;;  %v1276_v53 = vpop.f32.mrb[5].mxu1 }
 0x333   :  { %1286 = vst [vmem:[#allocation10 + $0x28] sm:$0x3f] %v1235_v14  ;;  %1288 = vst [vmem:[#allocation10 + $0x38] sm:$0x3f] %v1276_v53  ;;  %v1237_v15 = vpop.f32.mrb[6].mxu0  ;;  %v1278_v16 = vpop.f32.mrb[6].mxu1 }
 0x334   :  { %v1238_v17 = vpop.f32.mrb[7].mxu0  ;;  %v1279_v20 = vpop.f32.mrb[7].mxu1 }
 0x335   :  { %1557 = shalt.err (!%p1554_p8)
}
 0x336   :  { %s1558_s9 = scalar_lea.hbm %s1811_s7, 1024 }
 0x337   :  { %p1559_p9 = scmp.ne.s32.totalorder %s1811_s7, %s1558_s9  ;;  %p1562_p10 = scmp.lt.u32.totalorder %s1558_s9, %s1811_s7 }
 0x339   :  { %p1564_p11 = pnand %p1562_p10, %p1559_p9 }
 0x33b   :  { %1567 = shalt.err (!%p1564_p11)
}
 0x33c   :  { %1298 = dma.vmem_to_hbm [thread:$0]  %s1296_s28, 1024, %s1811_s7, [#allocation4]  }
 0x33d   :  { %1574 = dma.done.wait [#allocation4], 1024  }
 0x33e   :  { %1575 = vsyncadd [#allocation4], 4294966272 }
 0x33f   :  { %1302 = vsyncpa [#allocation3], 1 }
 0x340   :  { %1303 = vsyncpa [#allocation6], 1 }
 0x341   :  { %1304 = vsyncpa [#allocation9], 1 }
 0x342   :  { %1305 = vsyncpa [#allocation4], 1 }

</bundles_post_ra>
